<compile_context>
chip_gen: v7x
topology: tpu7x:2x2x1
jax: 0.10.0
libtpu: 0.0.40
codegen_flags: <defaults>
</compile_context>

<pallas_src>
import math

import jax
import jax.numpy as jnp
from jax import lax
from jax.experimental import pallas as pl
from jax.experimental.pallas import tpu as pltpu

LEAKAGE = 0.1
BN_EPS = 1e-5
LANE = 128


def _round_up(x, m):
    return (x + m - 1) // m * m


def _cdiv(a, b):
    return -(-a // b)


# ----------------------------------------------------------------------------
# Wrapper glue: im2col patch extraction in the (c, ky, kx) feature order that
# matches torch's weight.reshape(O, C*KH*KW), with the patch *rows* ordered
# (n, ho, w-parity, w//2) so the GEMM output reshapes for free into the
# lane-dense parity-split layout the pool kernel wants.
# Input is already centered and bf16, so the whole chain (slices, stacks,
# transposes, pads) fuses into one bf16 producer pass.
# ----------------------------------------------------------------------------
def _im2col_parity(xc, kh, kw, stride):
    n, c, h, w = xc.shape
    ho = (h - kh) // stride + 1
    wo = (w - kw) // stride + 1
    rows = []
    for ky in range(kh):
        cols = []
        for kx in range(kw):
            cols.append(
                xc[:, :,
                   ky:ky + stride * (ho - 1) + 1:stride,
                   kx:kx + stride * (wo - 1) + 1:stride])    # (N, C, Ho, Wo)
        rows.append(jnp.stack(cols, axis=2))                 # (N, C, kw, Ho, Wo)
    pat = jnp.stack(rows, axis=2)                            # (N, C, kh, kw, Ho, Wo)
    pat = pat.transpose(0, 4, 5, 1, 2, 3)                    # (N, Ho, Wo, C, kh, kw)
    k = c * kh * kw
    pat = pat.reshape(n, ho, wo, k)
    if wo % 2:                                               # pad W to even; dummy
        pat = jnp.pad(pat, ((0, 0), (0, 0), (0, 1), (0, 0)))  # column is never used
    wo2 = wo + (wo % 2)
    we = wo2 // 2
    # split wo = 2*we_idx + parity, then order rows (n, ho, parity, we_idx)
    pat = pat.reshape(n, ho, we, 2, k).transpose(0, 1, 3, 2, 4)
    return pat.reshape(n * ho * 2 * we, k), ho, wo, we


def _gemm_row_tile(m):
    # ~8192-row blocks (6 MiB bf16 at K=384), >=2 grid steps when M is large
    # (megacore), granularity 512 so M-padding waste stays <~6%.
    if m <= 1024:
        return _round_up(m, 8)
    n_steps = max(2, _cdiv(m, 8192))
    return _round_up(_cdiv(m, n_steps), 512)


# ----------------------------------------------------------------------------
# Kernel 1: conv as GEMM — (bf16 patches) @ (bf16 weights) + f32 bias.
# ----------------------------------------------------------------------------
def _conv_gemm_kernel(p_ref, w_ref, b_ref, o_ref):
    o_ref[...] = (
        jnp.dot(p_ref[...], w_ref[...], preferred_element_type=jnp.float32)
        + b_ref[...]
    )


def _conv_gemm(patches, w2d, b2d, tm):
    m_pad, k_pad = patches.shape
    cout = w2d.shape[1]
    return pl.pallas_call(
        _conv_gemm_kernel,
        out_shape=jax.ShapeDtypeStruct((m_pad, cout), jnp.float32),
        grid=(m_pad // tm,),
        in_specs=[
            pl.BlockSpec((tm, k_pad), lambda i: (i, 0)),
            pl.BlockSpec((k_pad, cout), lambda i: (0, 0)),
            pl.BlockSpec((1, cout), lambda i: (0, 0)),
        ],
        out_specs=pl.BlockSpec((tm, cout), lambda i: (i, 0)),
        compiler_params=pltpu.CompilerParams(
            dimension_semantics=("parallel",),
            vmem_limit_bytes=32 * 1024 * 1024),
    )(patches, w2d, b2d)


# ----------------------------------------------------------------------------
# Kernel 2a: MaxPool2d(3, stride=2) + per-image BN partial stats,
# on the lane-dense parity-split layout (2*Ho, We*C) per image.
#   row index = 2*ho + parity, lane index = (w//2)*C + c.
# Pool output column j = max over input columns {2j, 2j+1, 2j+2}
#                     = max(E_j, O_j, E_{j+1})  ->  three lane slices.
# ----------------------------------------------------------------------------
def _make_pool_stats_kernel(hp, wp, c):
    def kernel(c_ref, p_ref, s_ref):
        wpc = wp * c

        def hpool(par):
            # H-direction 3-tap max, stride 2: rows 2*(2i+dy)+par = par+2dy+4i
            m = c_ref[pl.ds(par, hp, stride=4), :]
            m = jnp.maximum(m, c_ref[pl.ds(par + 2, hp, stride=4), :])
            return jnp.maximum(m, c_ref[pl.ds(par + 4, hp, stride=4), :])

        eh = hpool(0)                                   # even W columns (Hp, We*C)
        oh = hpool(1)                                   # odd  W columns (Hp, We*C)

        pooled = jnp.maximum(jnp.maximum(eh[:, :wpc], oh[:, :wpc]),
                             eh[:, c:c + wpc])          # (Hp, Wp*C), lane-dense
        p_ref[...] = pooled

        # Per-channel partial stats: sum and sum-of-squares over (Hp, Wp).
        col = jnp.concatenate(
            [jnp.sum(pooled, axis=0, keepdims=True),
             jnp.sum(pooled * pooled, axis=0, keepdims=True)],
            axis=0)                                     # (2, Wp*C)
        s = col[:, 0:c]
        for j in range(1, wp):                          # fold the Wp lane groups
            s = s + col[:, j * c:(j + 1) * c]
        s_ref[...] = s                                  # single (2, C) store
    return kernel


def _pool_stats(conv3, hp, wp, c):
    n, ho2, wec = conv3.shape
    kernel = _make_pool_stats_kernel(hp, wp, c)
    return pl.pallas_call(
        kernel,
        out_shape=(jax.ShapeDtypeStruct((n, hp, wp * c), jnp.float32),
                   jax.ShapeDtypeStruct((n, 2, c), jnp.float32)),
        grid=(n,),
        in_specs=[pl.BlockSpec((None, ho2, wec), lambda i: (i, 0, 0))],
        out_specs=(pl.BlockSpec((None, hp, wp * c), lambda i: (i, 0, 0)),
                   pl.BlockSpec((None, 2, c), lambda i: (i, 0, 0))),
        compiler_params=pltpu.CompilerParams(
            dimension_semantics=("parallel",)),
    )(conv3)


# ----------------------------------------------------------------------------
# Kernel 2b: folded BN (scale/shift) + LeakyReLU on lane-dense (Hp, Wp*C) blocks.
# ----------------------------------------------------------------------------
def _bn_lrelu_kernel(p_ref, sc_ref, sh_ref, o_ref):
    y = p_ref[...] * sc_ref[...] + sh_ref[...]
    o_ref[...] = jnp.where(y >= 0.0, y, LEAKAGE * y)


def _bn_lrelu(pooled, scale_row, shift_row):
    n, hp, wpc = pooled.shape
    return pl.pallas_call(
        _bn_lrelu_kernel,
        out_shape=jax.ShapeDtypeStruct((n, hp, wpc), jnp.float32),
        grid=(n,),
        in_specs=[
            pl.BlockSpec((None, hp, wpc), lambda i: (i, 0, 0)),
            pl.BlockSpec((1, wpc), lambda i: (0, 0)),
            pl.BlockSpec((1, wpc), lambda i: (0, 0)),
        ],
        out_specs=pl.BlockSpec((None, hp, wpc), lambda i: (i, 0, 0)),
        compiler_params=pltpu.CompilerParams(
            dimension_semantics=("parallel",)),
    )(pooled, scale_row, shift_row)


# ----------------------------------------------------------------------------
# Full ParseImage forward.
# ----------------------------------------------------------------------------
def parse_image_forward(x, w, b, gamma, beta):
    """x: (N, 3, H, W) NCHW float32 -> (N, 16, Hp, Wp) NCHW float32."""
    n, c_in, _, _ = x.shape
    c_out, _, kh, kw = w.shape

    # Centering + bf16 cast BEFORE patch extraction: one fused bf16 producer.
    xc = (x.astype(jnp.float32) - 127.5).astype(jnp.bfloat16)
    patches, ho, wo, we = _im2col_parity(xc, kh, kw, stride=2)
    m, k = patches.shape

    k_pad = _round_up(k, LANE)                      # 363 -> 384 (lane-aligned K)
    tm = _gemm_row_tile(m)
    m_pad = _round_up(m, tm)
    patches = jnp.pad(patches, ((0, m_pad - m), (0, k_pad - k)))

    w2d = w.reshape(c_out, c_in * kh * kw).T.astype(jnp.bfloat16)   # (K, Cout)
    w2d = jnp.pad(w2d, ((0, k_pad - k), (0, 0)))
    b2d = b.reshape(1, c_out).astype(jnp.float32)

    conv_flat = _conv_gemm(patches, w2d, b2d, tm)[:m]               # (M, 16) f32
    # Free reshape: rows are ordered (n, ho, parity, w//2).
    conv3 = conv_flat.reshape(n, 2 * ho, we * c_out)                # (N, 2Ho, We*C)

    hp = (ho - 3) // 2 + 1
    wp = (wo - 3) // 2 + 1
    pooled, stats = _pool_stats(conv3, hp, wp, c_out)               # (N,Hp,Wp*C),(N,2,C)

    # BN finalize on 2*C scalars (training-mode batch stats, biased variance),
    # folded into a single per-channel scale + shift.
    count = float(n * hp * wp)
    tot = jnp.sum(stats, axis=0)                                    # (2, C)
    mean = tot[0] / count
    var = tot[1] / count - mean * mean
    scale = gamma.astype(jnp.float32) * lax.rsqrt(var + BN_EPS)
    shift = beta.astype(jnp.float32) - mean * scale

    y = _bn_lrelu(pooled,
                  jnp.tile(scale.reshape(1, c_out), (1, wp)),       # (1, Wp*C)
                  jnp.tile(shift.reshape(1, c_out), (1, wp)))
    return y.reshape(n, hp, wp, c_out).transpose(0, 3, 1, 2)        # NCHW


# ----------------------------------------------------------------------------
# Pure-JAX f32 reference (for self-check).
# ----------------------------------------------------------------------------
def _reference(x, w, b, gamma, beta):
    xc = x.astype(jnp.float32) - 127.5
    conv = lax.conv_general_dilated(
        xc, w, window_strides=(2, 2), padding="VALID",
        dimension_numbers=("NCHW", "OIHW", "NCHW")) + b.reshape(1, -1, 1, 1)
    pooled = lax.reduce_window(conv, -jnp.inf, lax.max,
                               (1, 1, 3, 3), (1, 1, 2, 2), "VALID")
    mean = pooled.mean(axis=(0, 2, 3), keepdims=True)
    var = ((pooled - mean) ** 2).mean(axis=(0, 2, 3), keepdims=True)
    xn = (pooled - mean) / jnp.sqrt(var + BN_EPS)
    y = gamma.reshape(1, -1, 1, 1) * xn + beta.reshape(1, -1, 1, 1)
    return jnp.where(y >= 0.0, y, LEAKAGE * y)


if __name__ == "__main__":
    key = jax.random.PRNGKey(0)
    kx, kw_, kb_ = jax.random.split(key, 3)

    # Small but valid shapes: Conv2d(3,16,11,stride=2) then MaxPool(3,2).
    N, C_IN, H, W = 2, 3, 33, 33
    C_OUT, KH, KW = 16, 11, 11

    # Image-like input in [0, 255].
    x = jax.random.uniform(kx, (N, C_IN, H, W), jnp.float32, 0.0, 255.0)

    # Conv2dReLUInit: normal(std = sqrt(2 / ((1 + leakage) * KH*KW * C_in)))
    std = math.sqrt(2.0 / ((1.0 + LEAKAGE) * KH * KW * C_IN))
    w = std * jax.random.normal(kw_, (C_OUT, C_IN, KH, KW), jnp.float32)
    # nn.Conv2d default bias init: U(-1/sqrt(fan_in), 1/sqrt(fan_in))
    bound = 1.0 / math.sqrt(C_IN * KH * KW)
    b = jax.random.uniform(kb_, (C_OUT,), jnp.float32, -bound, bound)
    # BatchNorm2d default affine params.
    gamma = jnp.ones((C_OUT,), jnp.float32)
    beta = jnp.zeros((C_OUT,), jnp.float32)

    fwd = jax.jit(parse_image_forward)
    ref_fn = jax.jit(_reference)

    out = jax.block_until_ready(fwd(x, w, b, gamma, beta))
    ref = jax.block_until_ready(ref_fn(x, w, b, gamma, beta))

    assert out.shape == ref.shape == (N, C_OUT, 5, 5), out.shape
    assert jnp.all(jnp.isfinite(out))
    # Tolerance covers the deliberate bf16 patch/weight storage (same rounding
    # points as the previously accepted version); observed error is well below.
    err = float(jnp.max(jnp.abs(out - ref)))
    assert jnp.allclose(out, ref, atol=2e-2, rtol=1e-2), err

    print("KERNEL_OK")
</pallas_src>

<mosaic_0001>
module attributes {stable_mosaic.version = 11 : i64} {
  func.func @_conv_gemm_kernel(%arg0: i32, %arg1: memref<288x384xbf16, #tpu.memory_space<vmem>>, %arg2: memref<384x16xbf16, #tpu.memory_space<vmem>>, %arg3: memref<1x16xf32, #tpu.memory_space<vmem>>, %arg4: memref<288x16xf32, #tpu.memory_space<vmem>>) attributes {dimension_semantics = [#tpu.dimension_semantics<parallel>], iteration_bounds = array<i64: 1>, scalar_prefetch = 0 : i64, scratch_operands = 0 : i64, tpu.core_type = #tpu.core_type<tc>, window_params = [{transform_indices = @transform_0, window_bounds = array<i64: 288, 384>}, {pipeline_mode = #tpu.pipeline_mode<synchronous>, transform_indices = @transform_1, window_bounds = array<i64: 384, 16>}, {pipeline_mode = #tpu.pipeline_mode<synchronous>, transform_indices = @transform_2, window_bounds = array<i64: 1, 16>}, {transform_indices = @transform_3, window_bounds = array<i64: 288, 16>}]} {
    %c0 = arith.constant 0 : index
    %c0_0 = arith.constant 0 : index
    %0 = vector.load %arg1[%c0, %c0_0] : memref<288x384xbf16, #tpu.memory_space<vmem>>, vector<288x384xbf16>
    %c0_1 = arith.constant 0 : index
    %c0_2 = arith.constant 0 : index
    %1 = vector.load %arg2[%c0_1, %c0_2] : memref<384x16xbf16, #tpu.memory_space<vmem>>, vector<384x16xbf16>
    %cst = arith.constant dense<0.000000e+00> : vector<288x16xf32>
    %2 = tpu.matmul %0, %1, %cst {dimension_numbers = #tpu.dot_dimension_numbers<[1], [0], [0], [1], [0, 0, 1, 1], [], []>} : vector<288x384xbf16>, vector<384x16xbf16>, vector<288x16xf32> -> vector<288x16xf32>
    %c0_3 = arith.constant 0 : index
    %c0_4 = arith.constant 0 : index
    %3 = vector.load %arg3[%c0_3, %c0_4] : memref<1x16xf32, #tpu.memory_space<vmem>>, vector<1x16xf32>
    %4 = vector.broadcast %3 : vector<1x16xf32> to vector<288x16xf32>
    %5 = arith.addf %2, %4 : vector<288x16xf32>
    %c0_5 = arith.constant 0 : index
    %c0_6 = arith.constant 0 : index
    %6 = vector.load %arg4[%c0_5, %c0_6] : memref<288x16xf32, #tpu.memory_space<vmem>>, vector<288x16xf32>
    tpu.vector_store %arg4[%c0_5, %c0_6], %5 {strides = array<i32>} : memref<288x16xf32, #tpu.memory_space<vmem>>, vector<288x16xf32>,
    return
  }
  func.func @transform_0(%arg0: i32) -> (i32, i32) {
    %c0_i32 = arith.constant 0 : i32
    %c0_i32_0 = arith.constant 0 : i32
    return %arg0, %c0_i32 : i32, i32
  }
  func.func @transform_1(%arg0: i32) -> (i32, i32) {
    %c0_i32 = arith.constant 0 : i32
    %c0_i32_0 = arith.constant 0 : i32
    %c0_i32_1 = arith.constant 0 : i32
    return %c0_i32, %c0_i32_0 : i32, i32
  }
  func.func @transform_2(%arg0: i32) -> (i32, i32) {
    %c0_i32 = arith.constant 0 : i32
    %c0_i32_0 = arith.constant 0 : i32
    %c0_i32_1 = arith.constant 0 : i32
    return %c0_i32, %c0_i32_0 : i32, i32
  }
  func.func @transform_3(%arg0: i32) -> (i32, i32) {
    %c0_i32 = arith.constant 0 : i32
    %c0_i32_0 = arith.constant 0 : i32
    return %arg0, %c0_i32 : i32, i32
  }
}

module attributes {stable_mosaic.version = 11 : i64} {
  func.func @kernel(%arg0: i32, %arg1: memref<1x24x96xf32, #tpu.memory_space<vmem>>, %arg2: memref<1x5x80xf32, #tpu.memory_space<vmem>>, %arg3: memref<1x2x16xf32, #tpu.memory_space<vmem>>) attributes {dimension_semantics = [#tpu.dimension_semantics<parallel>], iteration_bounds = array<i64: 2>, scalar_prefetch = 0 : i64, scratch_operands = 0 : i64, tpu.core_type = #tpu.core_type<tc>, window_params = [{transform_indices = @transform_0, window_bounds = array<i64: 1, 24, 96>}, {transform_indices = @transform_1, window_bounds = array<i64: 1, 5, 80>}, {transform_indices = @transform_2, window_bounds = array<i64: 1, 2, 16>}]} {
    %c0 = arith.constant 0 : index
    %c0_0 = arith.constant 0 : index
    %c0_1 = arith.constant 0 : index
    %0 = tpu.strided_load %arg1[%c0, %c0_0, %c0_1] {strides = array<i32: 1, 4, 1>} : memref<1x24x96xf32, #tpu.memory_space<vmem>>, vector<1x5x96xf32>
    %1 = vector.shape_cast %0 : vector<1x5x96xf32> to vector<5x96xf32>
    %c0_2 = arith.constant 0 : index
    %c2 = arith.constant 2 : index
    %c0_3 = arith.constant 0 : index
    %2 = tpu.strided_load %arg1[%c0_2, %c2, %c0_3] {strides = array<i32: 1, 4, 1>} : memref<1x24x96xf32, #tpu.memory_space<vmem>>, vector<1x5x96xf32>
    %3 = vector.shape_cast %2 : vector<1x5x96xf32> to vector<5x96xf32>
    %4 = arith.maximumf %1, %3 : vector<5x96xf32>
    %c0_4 = arith.constant 0 : index
    %c4 = arith.constant 4 : index
    %c0_5 = arith.constant 0 : index
    %5 = tpu.strided_load %arg1[%c0_4, %c4, %c0_5] {strides = array<i32: 1, 4, 1>} : memref<1x24x96xf32, #tpu.memory_space<vmem>>, vector<1x5x96xf32>
    %6 = vector.shape_cast %5 : vector<1x5x96xf32> to vector<5x96xf32>
    %7 = arith.maximumf %4, %6 : vector<5x96xf32>
    %c0_6 = arith.constant 0 : index
    %c1 = arith.constant 1 : index
    %c0_7 = arith.constant 0 : index
    %8 = tpu.strided_load %arg1[%c0_6, %c1, %c0_7] {strides = array<i32: 1, 4, 1>} : memref<1x24x96xf32, #tpu.memory_space<vmem>>, vector<1x5x96xf32>
    %9 = vector.shape_cast %8 : vector<1x5x96xf32> to vector<5x96xf32>
    %c0_8 = arith.constant 0 : index
    %c3 = arith.constant 3 : index
    %c0_9 = arith.constant 0 : index
    %10 = tpu.strided_load %arg1[%c0_8, %c3, %c0_9] {strides = array<i32: 1, 4, 1>} : memref<1x24x96xf32, #tpu.memory_space<vmem>>, vector<1x5x96xf32>
    %11 = vector.shape_cast %10 : vector<1x5x96xf32> to vector<5x96xf32>
    %12 = arith.maximumf %9, %11 : vector<5x96xf32>
    %c0_10 = arith.constant 0 : index
    %c5 = arith.constant 5 : index
    %c0_11 = arith.constant 0 : index
    %13 = tpu.strided_load %arg1[%c0_10, %c5, %c0_11] {strides = array<i32: 1, 4, 1>} : memref<1x24x96xf32, #tpu.memory_space<vmem>>, vector<1x5x96xf32>
    %14 = vector.shape_cast %13 : vector<1x5x96xf32> to vector<5x96xf32>
    %15 = arith.maximumf %12, %14 : vector<5x96xf32>
    %16 = vector.extract_strided_slice %7 {offsets = [0, 0], sizes = [5, 80], strides = [1, 1]} : vector<5x96xf32> to vector<5x80xf32>
    %17 = vector.extract_strided_slice %15 {offsets = [0, 0], sizes = [5, 80], strides = [1, 1]} : vector<5x96xf32> to vector<5x80xf32>
    %18 = arith.maximumf %16, %17 : vector<5x80xf32>
    %19 = vector.extract_strided_slice %7 {offsets = [0, 16], sizes = [5, 80], strides = [1, 1]} : vector<5x96xf32> to vector<5x80xf32>
    %20 = arith.maximumf %18, %19 : vector<5x80xf32>
    %c0_12 = arith.constant 0 : index
    %c0_13 = arith.constant 0 : index
    %c0_14 = arith.constant 0 : index
    %21 = vector.load %arg2[%c0_12, %c0_13, %c0_14] : memref<1x5x80xf32, #tpu.memory_space<vmem>>, vector<1x5x80xf32>
    %22 = vector.shape_cast %21 : vector<1x5x80xf32> to vector<5x80xf32>
    %23 = vector.shape_cast %20 : vector<5x80xf32> to vector<1x5x80xf32>
    tpu.vector_store %arg2[%c0_12, %c0_13, %c0_14], %23 {strides = array<i32>} : memref<1x5x80xf32, #tpu.memory_space<vmem>>, vector<1x5x80xf32>,
    %cst = arith.constant dense<0.000000e+00> : vector<80xf32>
    %24 = vector.multi_reduction <add>, %20, %cst [0] : vector<5x80xf32> to vector<80xf32>
    %25 = vector.shape_cast %24 : vector<80xf32> to vector<1x80xf32>
    %26 = arith.mulf %20, %20 : vector<5x80xf32>
    %cst_15 = arith.constant dense<0.000000e+00> : vector<80xf32>
    %27 = vector.multi_reduction <add>, %26, %cst_15 [0] : vector<5x80xf32> to vector<80xf32>
    %28 = vector.shape_cast %27 : vector<80xf32> to vector<1x80xf32>
    %29 = tpu.concatenate %25, %28 in 0 : vector<1x80xf32>, vector<1x80xf32> -> vector<2x80xf32>
    %30 = vector.extract_strided_slice %29 {offsets = [0, 0], sizes = [2, 16], strides = [1, 1]} : vector<2x80xf32> to vector<2x16xf32>
    %31 = vector.extract_strided_slice %29 {offsets = [0, 16], sizes = [2, 16], strides = [1, 1]} : vector<2x80xf32> to vector<2x16xf32>
    %32 = arith.addf %30, %31 : vector<2x16xf32>
    %33 = vector.extract_strided_slice %29 {offsets = [0, 32], sizes = [2, 16], strides = [1, 1]} : vector<2x80xf32> to vector<2x16xf32>
    %34 = arith.addf %32, %33 : vector<2x16xf32>
    %35 = vector.extract_strided_slice %29 {offsets = [0, 48], sizes = [2, 16], strides = [1, 1]} : vector<2x80xf32> to vector<2x16xf32>
    %36 = arith.addf %34, %35 : vector<2x16xf32>
    %37 = vector.extract_strided_slice %29 {offsets = [0, 64], sizes = [2, 16], strides = [1, 1]} : vector<2x80xf32> to vector<2x16xf32>
    %38 = arith.addf %36, %37 : vector<2x16xf32>
    %c0_16 = arith.constant 0 : index
    %c0_17 = arith.constant 0 : index
    %c0_18 = arith.constant 0 : index
    %39 = vector.load %arg3[%c0_16, %c0_17, %c0_18] : memref<1x2x16xf32, #tpu.memory_space<vmem>>, vector<1x2x16xf32>
    %40 = vector.shape_cast %39 : vector<1x2x16xf32> to vector<2x16xf32>
    %41 = vector.shape_cast %38 : vector<2x16xf32> to vector<1x2x16xf32>
    tpu.vector_store %arg3[%c0_16, %c0_17, %c0_18], %41 {strides = array<i32>} : memref<1x2x16xf32, #tpu.memory_space<vmem>>, vector<1x2x16xf32>,
    return
  }
  func.func @transform_0(%arg0: i32) -> (i32, i32, i32) {
    %c0_i32 = arith.constant 0 : i32
    %c0_i32_0 = arith.constant 0 : i32
    %c0_i32_1 = arith.constant 0 : i32
    return %arg0, %c0_i32, %c0_i32_0 : i32, i32, i32
  }
  func.func @transform_1(%arg0: i32) -> (i32, i32, i32) {
    %c0_i32 = arith.constant 0 : i32
    %c0_i32_0 = arith.constant 0 : i32
    %c0_i32_1 = arith.constant 0 : i32
    return %arg0, %c0_i32, %c0_i32_0 : i32, i32, i32
  }
  func.func @transform_2(%arg0: i32) -> (i32, i32, i32) {
    %c0_i32 = arith.constant 0 : i32
    %c0_i32_0 = arith.constant 0 : i32
    %c0_i32_1 = arith.constant 0 : i32
    return %arg0, %c0_i32, %c0_i32_0 : i32, i32, i32
  }
}

module attributes {stable_mosaic.version = 11 : i64} {
  func.func @_bn_lrelu_kernel(%arg0: i32, %arg1: memref<1x5x80xf32, #tpu.memory_space<vmem>>, %arg2: memref<1x80xf32, #tpu.memory_space<vmem>>, %arg3: memref<1x80xf32, #tpu.memory_space<vmem>>, %arg4: memref<1x5x80xf32, #tpu.memory_space<vmem>>) attributes {dimension_semantics = [#tpu.dimension_semantics<parallel>], iteration_bounds = array<i64: 2>, scalar_prefetch = 0 : i64, scratch_operands = 0 : i64, tpu.core_type = #tpu.core_type<tc>, window_params = [{transform_indices = @transform_0, window_bounds = array<i64: 1, 5, 80>}, {pipeline_mode = #tpu.pipeline_mode<synchronous>, transform_indices = @transform_1, window_bounds = array<i64: 1, 80>}, {pipeline_mode = #tpu.pipeline_mode<synchronous>, transform_indices = @transform_2, window_bounds = array<i64: 1, 80>}, {transform_indices = @transform_3, window_bounds = array<i64: 1, 5, 80>}]} {
    %c0 = arith.constant 0 : index
    %c0_0 = arith.constant 0 : index
    %c0_1 = arith.constant 0 : index
    %0 = vector.load %arg1[%c0, %c0_0, %c0_1] : memref<1x5x80xf32, #tpu.memory_space<vmem>>, vector<1x5x80xf32>
    %1 = vector.shape_cast %0 : vector<1x5x80xf32> to vector<5x80xf32>
    %c0_2 = arith.constant 0 : index
    %c0_3 = arith.constant 0 : index
    %2 = vector.load %arg2[%c0_2, %c0_3] : memref<1x80xf32, #tpu.memory_space<vmem>>, vector<1x80xf32>
    %3 = vector.broadcast %2 : vector<1x80xf32> to vector<5x80xf32>
    %4 = arith.mulf %1, %3 : vector<5x80xf32>
    %c0_4 = arith.constant 0 : index
    %c0_5 = arith.constant 0 : index
    %5 = vector.load %arg3[%c0_4, %c0_5] : memref<1x80xf32, #tpu.memory_space<vmem>>, vector<1x80xf32>
    %6 = vector.broadcast %5 : vector<1x80xf32> to vector<5x80xf32>
    %7 = arith.addf %4, %6 : vector<5x80xf32>
    %cst = arith.constant 0.000000e+00 : f32
    %8 = vector.broadcast %cst : f32 to vector<5x80xf32>
    %9 = arith.cmpf oge, %7, %8 : vector<5x80xf32>
    %cst_6 = arith.constant 1.000000e-01 : f32
    %10 = vector.broadcast %cst_6 : f32 to vector<5x80xf32>
    %11 = arith.mulf %10, %7 : vector<5x80xf32>
    %12 = arith.select %9, %7, %11 : vector<5x80xi1>, vector<5x80xf32>
    %c0_7 = arith.constant 0 : index
    %c0_8 = arith.constant 0 : index
    %c0_9 = arith.constant 0 : index
    %13 = vector.load %arg4[%c0_7, %c0_8, %c0_9] : memref<1x5x80xf32, #tpu.memory_space<vmem>>, vector<1x5x80xf32>
    %14 = vector.shape_cast %13 : vector<1x5x80xf32> to vector<5x80xf32>
    %15 = vector.shape_cast %12 : vector<5x80xf32> to vector<1x5x80xf32>
    tpu.vector_store %arg4[%c0_7, %c0_8, %c0_9], %15 {strides = array<i32>} : memref<1x5x80xf32, #tpu.memory_space<vmem>>, vector<1x5x80xf32>,
    return
  }
  func.func @transform_0(%arg0: i32) -> (i32, i32, i32) {
    %c0_i32 = arith.constant 0 : i32
    %c0_i32_0 = arith.constant 0 : i32
    %c0_i32_1 = arith.constant 0 : i32
    return %arg0, %c0_i32, %c0_i32_0 : i32, i32, i32
  }
  func.func @transform_1(%arg0: i32) -> (i32, i32) {
    %c0_i32 = arith.constant 0 : i32
    %c0_i32_0 = arith.constant 0 : i32
    %c0_i32_1 = arith.constant 0 : i32
    return %c0_i32, %c0_i32_0 : i32, i32
  }
  func.func @transform_2(%arg0: i32) -> (i32, i32) {
    %c0_i32 = arith.constant 0 : i32
    %c0_i32_0 = arith.constant 0 : i32
    %c0_i32_1 = arith.constant 0 : i32
    return %c0_i32, %c0_i32_0 : i32, i32
  }
  func.func @transform_3(%arg0: i32) -> (i32, i32, i32) {
    %c0_i32 = arith.constant 0 : i32
    %c0_i32_0 = arith.constant 0 : i32
    %c0_i32_1 = arith.constant 0 : i32
    return %arg0, %c0_i32, %c0_i32_0 : i32, i32, i32
  }
}

</mosaic_0001>

<bundles_post_ra>
// kernel: parse_image_forward.4
= control target key start
LH: loop header
LB: loop body
LE: loop exit
PB: predicated region body
PF: predicated region fallthrough
CT: control target
= control target key end

     0   :  { %s351_s9 = smov 0   ;;  %s376_s0 = inlined_call_operand.vmem [shape: f32[2,24,96], index: 0, kind: input, shape index: {}]   ;;  %s377_s1 = inlined_call_operand.vmem [shape: f32[2,5,80], index: 1, kind: output, shape index: {0}]   ;;  %s378_s2 = inlined_call_operand.vmem [shape: f32[2,2,16], index: 2, kind: output, shape index: {1}]  }
   0x1 LB: > { %s296_s10 = sadd.s32 4294967295, %s330_s9   ;;  %p300_p0 = scmp.ge.s32.totalorder %s330_s9, 1  ;;  %s330_s9 = sphi %s351_s9, %s13_s9  }
   0x2   : > { %p115_p1 = scmp.lt.s32.totalorder %s330_s9, 3 }
   0x4   : > { %p116_p2 = pnand %p300_p0, %p115_p1 }
   0x5   : > { %p140_p3 = scmp.lt.s32.totalorder (!%p116_p2), %s296_s10, 1  ;;  %s332_s15 = smov (!%p116_p2), 112   ;;  %vm174_vm0 = vcmask (!%p116_p2), 651264   ;;  %vm191_vm1 = vcmask (!%p116_p2), 1040384   ;;  %vm210_vm2 = vcmask (!%p116_p2), 123904  }
   0x6   : > { %119 = sbr.rel (%p116_p2) target bundleno = 279 (0x117), region = 24  ;;  %s333_s20 = smov (!%p116_p2), 96  }
   0x7   : > { %s334_s21 = smov (!%p116_p2), 80   ;;  %s335_s22 = smov (!%p116_p2), 64  }
   0xd   : > { %s380_s10 = smov (!%p140_p3, %s296_s10), 1 }
   0xe   : > { %s311_s11 = smul.u32 24, %s380_s10  ;;  %s302_s16 = sshll.u32 %s380_s10, 3 }
   0xf   : > { %s148_s19 = scalar_lea.vmem %s377_s1, %s302_s16  ;;  %s303_s23 = sshll.u32 %s380_s10, 1 }
  0x10   : > { %s144_s14 = scalar_lea.vmem %s376_s0, %s311_s11  ;;  %s152_s26 = scalar_lea.vmem %s378_s2, %s303_s23 }
  0x11   : > { %v153_v0 = vld [vmem:[%s144_s14] ss:$4 sm:$0x1f]  ;;  %v304_v1 = vld [vmem:[%s144_s14 + $0x2] ss:$4 sm:$0x1f] }
  0x12   : > { %v156_v2 = vmax.f32 %v153_v0, %v304_v1  ;;  %v305_v3 = vld [vmem:[%s144_s14 + $0x4] ss:$4 sm:$0x1f]  ;;  %v306_v4 = vld [vmem:[%s144_s14 + $0x1] ss:$4 sm:$0x1f] }
  0x13   : > { %v307_v5 = vld [vmem:[%s144_s14 + $0x3] ss:$4 sm:$0x1f]  ;;  %v308_v6 = vld [vmem:[%s144_s14 + $0x5] ss:$4 sm:$0x1f] }
  0x14   : > { %v159_v7 = vmax.f32 %v156_v2, %v305_v3  ;;  %v164_v8 = vmax.f32 %v306_v4, %v307_v5 }
  0x16   : > { %170 = vrot.lane.b32.xlu0 %v159_v7, %s332_s15  ;;  %v167_v9 = vmax.f32 %v164_v8, %v308_v6 }
  0x18   : > { %v168_v10 = vmax.f32 %v159_v7, %v167_v9 }
  0x88   : > { %v171_v11 = vpop.permute.xlu0 %170 }
  0x89   : > { %v173_v12 = vmax.f32 %v168_v10, %v171_v11 }
  0x8b   : > { %175 = vst.msk [vmem:[%s148_s19] sm:$0x1f] %vm174_vm0, %v173_v12  ;;  %v176_v13 = vsel %vm174_vm0, %v173_v12, 0.0  ;;  %v183_v14 = vmul.f32 %v173_v12, %v173_v12 }
  0x8c   : > { %v177_v15 = vrot.slane %v176_v13, 4 }
  0x8d   : > { %v184_v16 = vsel %vm174_vm0, %v183_v14, 0.0 }
  0x8e   : > { %v178_v17 = vadd.f32 %v177_v15, %v176_v13  ;;  %v185_v18 = vrot.slane %v184_v16, 4 }
  0x90   : > { %v179_v19 = vrot.slane %v178_v17, 2  ;;  %v186_v20 = vadd.f32 %v185_v18, %v184_v16 }
  0x92   : > { %v180_v21 = vadd.f32 %v179_v19, %v178_v17  ;;  %v187_v22 = vrot.slane %v186_v20, 2 }
  0x94   : > { %v181_v23 = vrot.slane %v180_v21, 1  ;;  %v188_v24 = vadd.f32 %v187_v22, %v186_v20 }
  0x96   : > { %v189_v25 = vrot.slane %v188_v24, 1  ;;  %v182_v26 = vadd.f32 %v181_v23, %v180_v21 }
  0x98   : > { %v190_v27 = vadd.f32 %v189_v25, %v188_v24 }
  0x9a   : > { %v192_v28 = vsel %vm191_vm1, %v182_v26, %v190_v27 }
  0x9b   : > { %198 = vrot.lane.b32.xlu1 %v192_v28, %s333_s20  ;;  %194 = vrot.lane.b32.xlu0 %v192_v28, %s332_s15 }
  0x9f   : > { %202 = vrot.lane.b32.xlu1 %v192_v28, %s334_s21  ;;  %206 = vrot.lane.b32.xlu0 %v192_v28, %s335_s22 }
 0x10d   : > { %v199_v29 = vpop.permute.xlu1 %198  ;;  %v195_v30 = vpop.permute.xlu0 %194 }
 0x10e   : > { %v197_v31 = vadd.f32 %v195_v30, %v192_v28 }
 0x110   : > { %v201_v32 = vadd.f32 %v199_v29, %v197_v31 }
 0x111   : > { %v203_v33 = vpop.permute.xlu1 %202  ;;  %v207_v35 = vpop.permute.xlu0 %206 }
 0x112   : > { %v205_v34 = vadd.f32 %v203_v33, %v201_v32 }
 0x114   : > { %v209_v36 = vadd.f32 %v207_v35, %v205_v34 }
 0x116   : > { %211 = vst.msk [vmem:[%s152_s26] sm:$0x3] %vm210_vm2, %v209_v36 }
 0x117 PF: > { %s13_s9 = sadd.s32 1, %s330_s9  }
 0x118   : > { %p10_p4 = scmp.ge.s32.totalorder %s13_s9, 4  }
 0x11a   :  { %12 = sbr.rel (!%p10_p4) target bundleno = 1 (0x1), region = 71 }

// kernel: parse_image_forward.3
= control target key start
LH: loop header
LB: loop body
LE: loop exit
PB: predicated region body
PF: predicated region fallthrough
CT: control target
= control target key end

     0   :  { %v1255_v0 = vmov 0   ;;  %vm928_vm0 = vcmask 130048   ;;  %s1757_s1 = inlined_call_operand.vmem [shape: bf16[384,16], index: 1, kind: input, shape index: {}]   ;;  %s1758_s0 = inlined_call_operand.vmem [shape: bf16[288,384], index: 0, kind: input, shape index: {}]   ;;  %s1759_s2 = inlined_call_operand.vmem [shape: f32[1,16], index: 2, kind: input, shape index: {}]   ;;  %s1760_s3 = inlined_call_operand.vmem [shape: f32[288,16], index: 3, kind: output, shape index: {}]  }
   0x1   :  { %574 = vmatprep.subr.bf16.mxu0 %v1255_v0  ;;  %1126 = vmatprep.subr.bf16.mxu1 %v1255_v0  ;;  %v1159_v1 = vld [vmem:[%s1757_s1] sm:$0xff]   ;;  %v1160_v2 = vld [vmem:[%s1757_s1 + $0x8] sm:$0xff]   ;;  %v1161_v3 = vld [vmem:[%s1757_s1 + $0x10] sm:$0xff]  }
   0x2   :  { %575 = vmatpush1.bf16.msra.mxu0 %v1159_v1  ;;  %1142 = vmatpush1.bf16.msra.mxu1 %v1159_v1  ;;  %v1162_v4 = vld [vmem:[%s1757_s1 + $0x18] sm:$0xff]   ;;  %v1163_v5 = vld [vmem:[%s1757_s1 + $0x20] sm:$0xff]   ;;  %v1164_v7 = vld [vmem:[%s1757_s1 + $0x28] sm:$0xff]  }
   0x3   :  { %576 = vmatprep.subr.bf16.mxu0 %v1255_v0  ;;  %1127 = vmatprep.subr.bf16.mxu1 %v1255_v0  ;;  %v1177_v6 = vld [vmem:[%s1758_s0 + $0x4] ss:$12 sps:$4 sm:$0xff]   ;;  %v1180_v8 = vld [vmem:[%s1758_s0 + $0x154] ss:$12 sps:$4 sm:$0xff]   ;;  %v1166_v10 = vld [vmem:[%s1757_s1 + $0x38] sm:$0xff]  }
   0x4   :  { %606 = vmatprep.mubr.bf16.mxu0 %v1177_v6  ;;  %718 = vmatprep.mubr.bf16.mxu1 %v1180_v8  ;;  %v1165_v9 = vld [vmem:[%s1757_s1 + $0x30] sm:$0xff]   ;;  %v1167_v11 = vld [vmem:[%s1757_s1 + $0x40] sm:$0xff]   ;;  %v1168_v12 = vld [vmem:[%s1757_s1 + $0x48] sm:$0xff]  }
   0x5   :  { %v1169_v13 = vld [vmem:[%s1757_s1 + $0x50] sm:$0xff]   ;;  %v1170_v14 = vld [vmem:[%s1757_s1 + $0x58] sm:$0xff]   ;;  %v1171_v15 = vld [vmem:[%s1757_s1 + $0x60] sm:$0xff]  }
   0x6   :  { %577 = vmatpush1.bf16.msra.mxu0 %v1160_v2  ;;  %1143 = vmatpush1.bf16.msra.mxu1 %v1160_v2  ;;  %v1172_v16 = vld [vmem:[%s1757_s1 + $0x68] sm:$0xff]   ;;  %v1173_v17 = vld [vmem:[%s1757_s1 + $0x70] sm:$0xff]   ;;  %v1174_v18 = vld [vmem:[%s1757_s1 + $0x78] sm:$0xff]  }
   0x7   :  { %578 = vmatprep.subr.bf16.mxu0 %v1255_v0  ;;  %1128 = vmatprep.subr.bf16.mxu1 %v1255_v0  ;;  %v1181_v19 = vld [vmem:[%s1757_s1 + $0x80] sm:$0xff]   ;;  %v1178_v21 = vld [vmem:[%s1758_s0 + $0x150] ss:$12 sps:$4 sm:$0xff]   ;;  %v1182_v23 = vld [vmem:[%s1757_s1 + $0x88] sm:$0xff]  }
   0x8   :  { %v1175_v20 = vld [vmem:[%s1758_s0] ss:$12 sps:$4 sm:$0xff]   ;;  %v1183_v22 = vld [vmem:[%s1758_s0 + $0x1c] ss:$12 sps:$4 sm:$0xff]   ;;  %v1189_v25 = vld [vmem:[%s1757_s1 + $0x90] sm:$0xff]  }
   0x9   :  { %v1185_v24 = vld [vmem:[%s1758_s0 + $0x16c] ss:$12 sps:$4 sm:$0xff]   ;;  %v1188_v27 = vld [vmem:[%s1758_s0 + $0x168] ss:$12 sps:$4 sm:$0xff]   ;;  %v1193_v30 = vld [vmem:[%s1758_s0 + $0x184] ss:$12 sps:$4 sm:$0xff]  }
   0xa   :  { %579 = vmatpush1.bf16.msra.mxu0 %v1161_v3  ;;  %1144 = vmatpush1.bf16.msra.mxu1 %v1161_v3  ;;  %v1187_v26 = vld [vmem:[%s1758_s0 + $0x18] ss:$12 sps:$4 sm:$0xff]   ;;  %v1191_v28 = vld [vmem:[%s1758_s0 + $0x34] ss:$12 sps:$4 sm:$0xff]   ;;  %v1195_v32 = vld [vmem:[%s1758_s0 + $0x30] ss:$12 sps:$4 sm:$0xff]  }
   0xb   :  { %580 = vmatprep.subr.bf16.mxu0 %v1255_v0  ;;  %1129 = vmatprep.subr.bf16.mxu1 %v1255_v0  ;;  %v1190_v29 = vld [vmem:[%s1757_s1 + $0x98] sm:$0xff]   ;;  %v1197_v31 = vld [vmem:[%s1757_s1 + $0xa0] sm:$0xff]   ;;  %v1198_v35 = vld [vmem:[%s1757_s1 + $0xa8] sm:$0xff]  }
   0xc   :  { %v1196_v33 = vld [vmem:[%s1758_s0 + $0x180] ss:$12 sps:$4 sm:$0xff]   ;;  %v1201_v36 = vld [vmem:[%s1758_s0 + $0x19c] ss:$12 sps:$4 sm:$0xff]   ;;  %v1205_v37 = vld [vmem:[%s1757_s1 + $0xb0] sm:$0xff]  }
   0xd   :  { %v1199_v34 = vld [vmem:[%s1758_s0 + $0x4c] ss:$12 sps:$4 sm:$0xff]   ;;  %v1203_v38 = vld [vmem:[%s1758_s0 + $0x48] ss:$12 sps:$4 sm:$0xff]   ;;  %v1207_v40 = vld [vmem:[%s1758_s0 + $0x64] ss:$12 sps:$4 sm:$0xff]  }
   0xe   :  { %581 = vmatpush1.bf16.msra.mxu0 %v1162_v4  ;;  %1145 = vmatpush1.bf16.msra.mxu1 %v1162_v4  ;;  %v1204_v39 = vld [vmem:[%s1758_s0 + $0x198] ss:$12 sps:$4 sm:$0xff]   ;;  %v1209_v42 = vld [vmem:[%s1758_s0 + $0x8] ss:$12 sps:$4 sm:$0xff]   ;;  %v1210_v43 = vld [vmem:[%s1758_s0 + $0x60] ss:$12 sps:$4 sm:$0xff]  }
   0xf   :  { %582 = vmatprep.subr.bf16.mxu0 %v1255_v0  ;;  %1130 = vmatprep.subr.bf16.mxu1 %v1255_v0  ;;  %v1206_v41 = vld [vmem:[%s1757_s1 + $0xb8] sm:$0xff]   ;;  %v1211_v44 = vld [vmem:[%s1758_s0 + $0x20] ss:$12 sps:$4 sm:$0xff]   ;;  %v1219_v50 = vld [vmem:[%s1758_s0 + $0x68] ss:$12 sps:$4 sm:$0xff]  }
  0x10   :  { %v1212_v45 = vld [vmem:[%s1758_s0 + $0x7c] ss:$12 sps:$4 sm:$0xff]   ;;  %v1214_v46 = vld [vmem:[%s1758_s0 + $0x38] ss:$12 sps:$4 sm:$0xff]   ;;  %v1217_v49 = vld [vmem:[%s1758_s0 + $0x94] ss:$12 sps:$4 sm:$0xff]  }
  0x11   :  { %v1215_v47 = vld [vmem:[%s1758_s0 + $0x78] ss:$12 sps:$4 sm:$0xff]   ;;  %v1216_v48 = vld [vmem:[%s1758_s0 + $0x50] ss:$12 sps:$4 sm:$0xff]   ;;  %v1221_v52 = vld [vmem:[%s1758_s0 + $0x80] ss:$12 sps:$4 sm:$0xff]  }
  0x12   :  { %583 = vmatpush1.bf16.msra.mxu0 %v1163_v5  ;;  %1146 = vmatpush1.bf16.msra.mxu1 %v1163_v5  ;;  %v1220_v51 = vld [vmem:[%s1758_s0 + $0x90] ss:$12 sps:$4 sm:$0xff]   ;;  %v1222_v53 = vld [vmem:[%s1758_s0 + $0xac] ss:$12 sps:$4 sm:$0xff]   ;;  %v1225_v55 = vld [vmem:[%s1758_s0 + $0xa8] ss:$12 sps:$4 sm:$0xff]  }
  0x13   :  { %584 = vmatprep.subr.bf16.mxu0 %v1255_v0  ;;  %1131 = vmatprep.subr.bf16.mxu1 %v1255_v0  ;;  %v1224_v54 = vld [vmem:[%s1758_s0 + $0x98] ss:$12 sps:$4 sm:$0xff]   ;;  %v1226_v56 = vld [vmem:[%s1758_s0 + $0xb0] ss:$12 sps:$4 sm:$0xff]   ;;  %v1229_v58 = vld [vmem:[%s1758_s0 + $0xc8] ss:$12 sps:$4 sm:$0xff]  }
  0x14   :  { %v1227_v57 = vld [vmem:[%s1758_s0 + $0xc4] ss:$12 sps:$4 sm:$0xff]   ;;  %v1230_v59 = vld [vmem:[%s1758_s0 + $0xc0] ss:$12 sps:$4 sm:$0xff]   ;;  %v1232_v61 = vld [vmem:[%s1758_s0 + $0xdc] ss:$12 sps:$4 sm:$0xff]  }
  0x15   :  { %v1231_v60 = vld [vmem:[%s1758_s0 + $0xe0] ss:$12 sps:$4 sm:$0xff]   ;;  %v1234_v62 = vld [vmem:[%s1758_s0 + $0xf8] ss:$12 sps:$4 sm:$0xff]   ;;  %v1239_v2 = vld [vmem:[%s1758_s0 + $0x128] ss:$12 sps:$4 sm:$0xff]  }
  0x16   :  { %585 = vmatpush1.bf16.msra.mxu0 %v1164_v7  ;;  %1147 = vmatpush1.bf16.msra.mxu1 %v1164_v7  ;;  %v1235_v63 = vld [vmem:[%s1758_s0 + $0xd8] ss:$12 sps:$4 sm:$0xff]   ;;  %v1237_v1 = vld [vmem:[%s1758_s0 + $0xf4] ss:$12 sps:$4 sm:$0xff]   ;;  %v1240_v3 = vld [vmem:[%s1758_s0 + $0xf0] ss:$12 sps:$4 sm:$0xff]  }
  0x17   :  { %586 = vmatprep.subr.bf16.mxu0 %v1255_v0  ;;  %1132 = vmatprep.subr.bf16.mxu1 %v1255_v0  ;;  %v1241_v4 = vld [vmem:[%s1758_s0 + $0x140] ss:$12 sps:$4 sm:$0xff]   ;;  %v1244_v6 = vld [vmem:[%s1758_s0 + $0x158] ss:$12 sps:$4 sm:$0xff]   ;;  %v1245_v7 = vld [vmem:[%s1758_s0 + $0x108] ss:$12 sps:$4 sm:$0xff]  }
  0x18   :  { %v1242_v5 = vld [vmem:[%s1758_s0 + $0x10c] ss:$12 sps:$4 sm:$0xff]   ;;  %v1246_v8 = vld [vmem:[%s1758_s0 + $0x170] ss:$12 sps:$4 sm:$0xff]  }
  0x1a   :  { %587 = vmatpush1.bf16.msra.mxu0 %v1165_v9  ;;  %1148 = vmatpush1.bf16.msra.mxu1 %v1165_v9  ;;  %v1247_v9 = vld [vmem:[%s1758_s0 + $0x124] ss:$12 sps:$4 sm:$0xff]  }
  0x1b   :  { %588 = vmatprep.subr.bf16.mxu0 %v1255_v0  ;;  %1133 = vmatprep.subr.bf16.mxu1 %v1255_v0 }
  0x1e   :  { %589 = vmatpush1.bf16.msra.mxu0 %v1166_v10  ;;  %1149 = vmatpush1.bf16.msra.mxu1 %v1166_v10  ;;  %v1249_v10 = vld [vmem:[%s1758_s0 + $0x188] ss:$12 sps:$4 sm:$0xff]  }
  0x1f   :  { %590 = vmatprep.subr.bf16.mxu0 %v1255_v0  ;;  %1134 = vmatprep.subr.bf16.mxu1 %v1255_v0 }
  0x22   :  { %591 = vmatpush1.bf16.msra.mxu0 %v1167_v11  ;;  %1150 = vmatpush1.bf16.msra.mxu1 %v1167_v11  ;;  %v1250_v11 = vld [vmem:[%s1758_s0 + $0x120] ss:$12 sps:$4 sm:$0xff]  }
  0x23   :  { %592 = vmatprep.subr.bf16.mxu0 %v1255_v0  ;;  %1135 = vmatprep.subr.bf16.mxu1 %v1255_v0 }
  0x26   :  { %593 = vmatpush1.bf16.msra.mxu0 %v1168_v12  ;;  %1151 = vmatpush1.bf16.msra.mxu1 %v1168_v12  ;;  %v1251_v12 = vld [vmem:[%s1758_s0 + $0x1a0] ss:$12 sps:$4 sm:$0xff]  }
  0x27   :  { %594 = vmatprep.subr.bf16.mxu0 %v1255_v0  ;;  %1136 = vmatprep.subr.bf16.mxu1 %v1255_v0 }
  0x2a   :  { %595 = vmatpush1.bf16.msra.mxu0 %v1169_v13  ;;  %1152 = vmatpush1.bf16.msra.mxu1 %v1169_v13  ;;  %v1252_v13 = vld [vmem:[%s1758_s0 + $0x13c] ss:$12 sps:$4 sm:$0xff]  }
  0x2b   :  { %596 = vmatprep.subr.bf16.mxu0 %v1255_v0  ;;  %1137 = vmatprep.subr.bf16.mxu1 %v1255_v0 }
  0x2e   :  { %597 = vmatpush1.bf16.msra.mxu0 %v1170_v14  ;;  %1153 = vmatpush1.bf16.msra.mxu1 %v1170_v14  ;;  %v1254_v14 = vld [vmem:[%s1758_s0 + $0x138] ss:$12 sps:$4 sm:$0xff]  }
  0x2f   :  { %598 = vmatprep.subr.bf16.mxu0 %v1255_v0  ;;  %1138 = vmatprep.subr.bf16.mxu1 %v1255_v0 }
  0x32   :  { %599 = vmatpush1.bf16.msra.mxu0 %v1171_v15  ;;  %1154 = vmatpush1.bf16.msra.mxu1 %v1171_v15 }
  0x33   :  { %600 = vmatprep.subr.bf16.mxu0 %v1255_v0  ;;  %1139 = vmatprep.subr.bf16.mxu1 %v1255_v0 }
  0x36   :  { %601 = vmatpush1.bf16.msra.mxu0 %v1172_v16  ;;  %1155 = vmatpush1.bf16.msra.mxu1 %v1172_v16 }
  0x37   :  { %602 = vmatprep.subr.bf16.mxu0 %v1255_v0  ;;  %1140 = vmatprep.subr.bf16.mxu1 %v1255_v0 }
  0x3a   :  { %603 = vmatpush1.bf16.msra.mxu0 %v1173_v17  ;;  %1156 = vmatpush1.bf16.msra.mxu1 %v1173_v17 }
  0x3b   :  { %604 = vmatprep.subr.bf16.mxu0 %v1255_v0  ;;  %1141 = vmatprep.subr.bf16.mxu1 %v1255_v0  ;;  %v1236_v0 = vld [vmem:[%s1758_s0 + $0x110] ss:$12 sps:$4 sm:$0xff]  }
  0x3e   :  { %605 = vmatpush1.bf16.msra.mxu0 %v1174_v18  ;;  %1157 = vmatpush1.bf16.msra.mxu1 %v1174_v18 }
  0x3f   :  { %1074 = vmatprep.subr.bf16.mxu1 %v1181_v19 }
  0x41   :  { %607 = vmatmul.mubr.bf16.vlgmr.msra.gmra.mrb[0].mxu0 %v1175_v20  ;;  %719 = vmatmul.mubr.bf16.vlgmr.msra.gmra.mrb[0].mxu1 %v1178_v21 }
  0x42   :  { %1075 = vmatpush3.bf16.msra.mxu1 %v1181_v19  ;;  %614 = vmatprep.mubr.bf16.mxu0 %v1183_v22 }
  0x43   :  { %1076 = vmatprep.subr.bf16.mxu1 %v1182_v23  ;;  %726 = vmatprep.mubr.bf16.mxu1 %v1185_v24 }
  0x46   :  { %1077 = vmatpush3.bf16.msra.mxu1 %v1182_v23 }
  0x47   :  { %1078 = vmatprep.subr.bf16.mxu1 %v1189_v25 }
  0x49   :  { %615 = vmatmul.mubr.bf16.gmra.mrb[4].mxu0 %v1187_v26  ;;  %727 = vmatmul.mubr.bf16.gmra.mrb[4].mxu1 %v1188_v27 }
  0x4a   :  { %1079 = vmatpush3.bf16.msra.mxu1 %v1189_v25  ;;  %622 = vmatprep.mubr.bf16.mxu0 %v1191_v28 }
  0x4b   :  { %1080 = vmatprep.subr.bf16.mxu1 %v1190_v29  ;;  %734 = vmatprep.mubr.bf16.mxu1 %v1193_v30 }
  0x4e   :  { %1081 = vmatpush3.bf16.msra.mxu1 %v1190_v29 }
  0x4f   :  { %1082 = vmatprep.subr.bf16.mxu1 %v1197_v31 }
  0x51   :  { %623 = vmatmul.mubr.bf16.gmra.mrb[8].mxu0 %v1195_v32  ;;  %735 = vmatmul.mubr.bf16.gmra.mrb[8].mxu1 %v1196_v33 }
  0x52   :  { %1083 = vmatpush3.bf16.msra.mxu1 %v1197_v31  ;;  %630 = vmatprep.mubr.bf16.mxu0 %v1199_v34 }
  0x53   :  { %1084 = vmatprep.subr.bf16.mxu1 %v1198_v35  ;;  %742 = vmatprep.mubr.bf16.mxu1 %v1201_v36 }
  0x56   :  { %1085 = vmatpush3.bf16.msra.mxu1 %v1198_v35 }
  0x57   :  { %1086 = vmatprep.subr.bf16.mxu1 %v1205_v37 }
  0x59   :  { %631 = vmatmul.mubr.bf16.gmra.mrb[12].mxu0 %v1203_v38  ;;  %743 = vmatmul.mubr.bf16.gmra.mrb[12].mxu1 %v1204_v39 }
  0x5a   :  { %1087 = vmatpush3.bf16.msra.mxu1 %v1205_v37  ;;  %638 = vmatprep.mubr.bf16.mxu0 %v1207_v40 }
  0x5b   :  { %1088 = vmatprep.subr.bf16.mxu1 %v1206_v41  ;;  %1090 = vmatprep.mubr.bf16.mxu1 %v1209_v42 }
  0x5e   :  { %1089 = vmatpush3.bf16.msra.mxu1 %v1206_v41 }
  0x61   :  { %639 = vmatmul.mubr.bf16.gmra.mrb[16].mxu0 %v1210_v43  ;;  %1091 = vmatmul.mubr.bf16.vlgmr.msra.gmra.mrb[16].mxu1 %v1211_v44 }
  0x62   :  { %646 = vmatprep.mubr.bf16.mxu0 %v1212_v45  ;;  %1094 = vmatprep.mubr.bf16.mxu1 %v1214_v46 }
  0x69   :  { %647 = vmatmul.mubr.bf16.gmra.mrb[20].mxu0 %v1215_v47  ;;  %1095 = vmatmul.mubr.bf16.gmra.mrb[20].mxu1 %v1216_v48  ;;  %v1561_v47 = vld [vmem:[%s1759_s2] ss:$0 sm:$0xff] }
  0x6a   :  { %654 = vmatprep.mubr.bf16.mxu0 %v1217_v49  ;;  %1098 = vmatprep.mubr.bf16.mxu1 %v1219_v50 }
  0x71   :  { %655 = vmatmul.mubr.bf16.gmra.mrb[24].mxu0 %v1220_v51  ;;  %1099 = vmatmul.mubr.bf16.gmra.mrb[24].mxu1 %v1221_v52 }
  0x72   :  { %662 = vmatprep.mubr.bf16.mxu0 %v1222_v53  ;;  %1102 = vmatprep.mubr.bf16.mxu1 %v1224_v54 }
  0x79   :  { %663 = vmatmul.mubr.bf16.gmra.mrb[28].mxu0 %v1225_v55  ;;  %1103 = vmatmul.mubr.bf16.gmra.mrb[28].mxu1 %v1226_v56 }
  0x7a   :  { %670 = vmatprep.mubr.bf16.mxu0 %v1227_v57  ;;  %1106 = vmatprep.mubr.bf16.mxu1 %v1229_v58 }
  0x81   :  { %671 = vmatmul.mubr.bf16.gmra.mrb[32].mxu0 %v1230_v59  ;;  %1107 = vmatmul.mubr.bf16.gmra.mrb[32].mxu1 %v1231_v60 }
  0x82   :  { %678 = vmatprep.mubr.bf16.mxu0 %v1232_v61  ;;  %1110 = vmatprep.mubr.bf16.mxu1 %v1234_v62 }
  0x89   :  { %679 = vmatmul.mubr.bf16.gmra.mrb[36].mxu0 %v1235_v63  ;;  %1111 = vmatmul.mubr.bf16.gmra.mrb[36].mxu1 %v1236_v0 }
  0x8a   :  { %686 = vmatprep.mubr.bf16.mxu0 %v1237_v1  ;;  %1114 = vmatprep.mubr.bf16.mxu1 %v1239_v2 }
  0x91   :  { %687 = vmatmul.mubr.bf16.gmra.mrb[40].mxu0 %v1240_v3  ;;  %1115 = vmatmul.mubr.bf16.gmra.mrb[40].mxu1 %v1241_v4 }
  0x92   :  { %694 = vmatprep.mubr.bf16.mxu0 %v1242_v5  ;;  %1118 = vmatprep.mubr.bf16.mxu1 %v1244_v6 }
  0x99   :  { %695 = vmatmul.mubr.bf16.gmra.mrb[44].mxu0 %v1245_v7  ;;  %1119 = vmatmul.mubr.bf16.gmra.mrb[44].mxu1 %v1246_v8 }
  0x9a   :  { %702 = vmatprep.mubr.bf16.mxu0 %v1247_v9  ;;  %1122 = vmatprep.mubr.bf16.mxu1 %v1249_v10 }
  0xa1   :  { %703 = vmatmul.mubr.bf16.gmra.mrb[48].mxu0 %v1250_v11  ;;  %1123 = vmatmul.mubr.bf16.gmra.mrb[48].mxu1 %v1251_v12 }
  0xa2   :  { %710 = vmatprep.mubr.bf16.mxu0 %v1252_v13 }
  0xa9   :  { %711 = vmatmul.mubr.bf16.gmra.mrb[52].mxu0 %v1254_v14 }
 0x114   :  { %v608_v15 = vpop.f32.mrb[0].mxu0  ;;  %v1542_v16 = vpop.f32.mrb[0].mxu1 }
 0x115   :  { %v610_v17 = vpop.f32.mrb[1].mxu0  ;;  %v722_v18 = vpop.f32.mrb[1].mxu1  ;;  %v609_v49 = vadd.f32 %v1561_v47, %v608_v15 }
 0x116   :  { %v611_v19 = vpop.f32.mrb[2].mxu0  ;;  %v1544_v20 = vpop.f32.mrb[2].mxu1 }
 0x117   :  { %v613_v21 = vpop.f32.mrb[3].mxu0  ;;  %v725_v22 = vpop.f32.mrb[3].mxu1  ;;  %v612_v56 = vadd.f32 %v1561_v47, %v611_v19 }
 0x11c   :  { %v616_v23 = vpop.f32.mrb[4].mxu0  ;;  %v1546_v24 = vpop.f32.mrb[4].mxu1 }
 0x11d   :  { %v618_v25 = vpop.f32.mrb[5].mxu0  ;;  %v730_v26 = vpop.f32.mrb[5].mxu1  ;;  %v617_v48 = vadd.f32 %v1561_v47, %v616_v23 }
 0x11e   :  { %v619_v27 = vpop.f32.mrb[6].mxu0  ;;  %v1548_v28 = vpop.f32.mrb[6].mxu1 }
 0x11f   :  { %v621_v29 = vpop.f32.mrb[7].mxu0  ;;  %v733_v30 = vpop.f32.mrb[7].mxu1  ;;  %v620_v52 = vadd.f32 %v1561_v47, %v619_v27 }
 0x124   :  { %v624_v31 = vpop.f32.mrb[8].mxu0  ;;  %v1550_v32 = vpop.f32.mrb[8].mxu1 }
 0x125   :  { %v626_v33 = vpop.f32.mrb[9].mxu0  ;;  %v738_v34 = vpop.f32.mrb[9].mxu1  ;;  %v625_v1 = vadd.f32 %v1561_v47, %v624_v31 }
 0x126   :  { %v627_v35 = vpop.f32.mrb[10].mxu0  ;;  %v1552_v36 = vpop.f32.mrb[10].mxu1 }
 0x127   :  { %v629_v37 = vpop.f32.mrb[11].mxu0  ;;  %v741_v38 = vpop.f32.mrb[11].mxu1  ;;  %v628_v8 = vadd.f32 %v1561_v47, %v627_v35 }
 0x12c   :  { %v632_v39 = vpop.f32.mrb[12].mxu0  ;;  %v1554_v40 = vpop.f32.mrb[12].mxu1 }
 0x12d   :  { %v634_v41 = vpop.f32.mrb[13].mxu0  ;;  %v746_v42 = vpop.f32.mrb[13].mxu1  ;;  %v633_v0 = vadd.f32 %v1561_v47, %v632_v39 }
 0x12e   :  { %v635_v43 = vpop.f32.mrb[14].mxu0  ;;  %v1556_v44 = vpop.f32.mrb[14].mxu1 }
 0x12f   :  { %v637_v45 = vpop.f32.mrb[15].mxu0  ;;  %v749_v46 = vpop.f32.mrb[15].mxu1  ;;  %v636_v4 = vadd.f32 %v1561_v47, %v635_v43 }
 0x134   :  { %v640_v50 = vpop.f32.mrb[16].mxu0  ;;  %v1092_v51 = vpop.f32.mrb[16].mxu1 }
 0x135   :  { %v794_v53 = vadd.f32 %v1092_v51, %v617_v48  ;;  %v642_v54 = vpop.f32.mrb[17].mxu0  ;;  %v785_v55 = vpop.f32.mrb[17].mxu1  ;;  %v641_v18 = vadd.f32 %v1561_v47, %v640_v50 }
 0x136   :  { %v786_v57 = vadd.f32 %v785_v55, %v609_v49  ;;  %v643_v58 = vpop.f32.mrb[18].mxu0  ;;  %v1093_v59 = vpop.f32.mrb[18].mxu1 }
 0x137   :  { %931 = vst.msk [vmem:[%s1760_s3 + $0x10] sm:$0xff] %vm928_vm0, %v794_v53  ;;  %v797_v60 = vadd.f32 %v1093_v59, %v620_v52  ;;  %v645_v61 = vpop.f32.mrb[19].mxu0  ;;  %v788_v62 = vpop.f32.mrb[19].mxu1  ;;  %v644_v27 = vadd.f32 %v1561_v47, %v643_v58 }
 0x138   :  { %929 = vst.msk [vmem:[%s1760_s3] sm:$0xff] %vm928_vm0, %v786_v57  ;;  %v789_v63 = vadd.f32 %v788_v62, %v612_v56 }
 0x139   :  { %932 = vst.msk [vmem:[%s1760_s3 + $0x18] sm:$0xff] %vm928_vm0, %v797_v60 }
 0x13a   :  { %930 = vst.msk [vmem:[%s1760_s3 + $0x8] sm:$0xff] %vm928_vm0, %v789_v63 }
 0x13c   :  { %v648_v2 = vpop.f32.mrb[20].mxu0  ;;  %v1096_v3 = vpop.f32.mrb[20].mxu1 }
 0x13d   :  { %v810_v5 = vadd.f32 %v1096_v3, %v633_v0  ;;  %v650_v6 = vpop.f32.mrb[21].mxu0  ;;  %v801_v7 = vpop.f32.mrb[21].mxu1  ;;  %v649_v17 = vadd.f32 %v1561_v47, %v648_v2 }
 0x13e   :  { %v802_v9 = vadd.f32 %v801_v7, %v625_v1  ;;  %v651_v10 = vpop.f32.mrb[22].mxu0  ;;  %v1097_v11 = vpop.f32.mrb[22].mxu1 }
 0x13f   :  { %935 = vst.msk [vmem:[%s1760_s3 + $0x30] sm:$0xff] %vm928_vm0, %v810_v5  ;;  %v813_v12 = vadd.f32 %v1097_v11, %v636_v4  ;;  %v653_v13 = vpop.f32.mrb[23].mxu0  ;;  %v804_v14 = vpop.f32.mrb[23].mxu1  ;;  %v652_v22 = vadd.f32 %v1561_v47, %v651_v10 }
 0x140   :  { %933 = vst.msk [vmem:[%s1760_s3 + $0x20] sm:$0xff] %vm928_vm0, %v802_v9  ;;  %v805_v15 = vadd.f32 %v804_v14, %v628_v8 }
 0x141   :  { %936 = vst.msk [vmem:[%s1760_s3 + $0x38] sm:$0xff] %vm928_vm0, %v813_v12 }
 0x142   :  { %934 = vst.msk [vmem:[%s1760_s3 + $0x28] sm:$0xff] %vm928_vm0, %v805_v15 }
 0x144   :  { %v656_v19 = vpop.f32.mrb[24].mxu0  ;;  %v1100_v21 = vpop.f32.mrb[24].mxu1 }
 0x145   :  { %v826_v23 = vadd.f32 %v1100_v21, %v649_v17  ;;  %v658_v25 = vpop.f32.mrb[25].mxu0  ;;  %v817_v26 = vpop.f32.mrb[25].mxu1  ;;  %v657_v38 = vadd.f32 %v1561_v47, %v656_v19 }
 0x146   :  { %v818_v29 = vadd.f32 %v817_v26, %v641_v18  ;;  %v659_v30 = vpop.f32.mrb[26].mxu0  ;;  %v1101_v31 = vpop.f32.mrb[26].mxu1 }
 0x147   :  { %939 = vst.msk [vmem:[%s1760_s3 + $0x50] sm:$0xff] %vm928_vm0, %v826_v23  ;;  %v829_v33 = vadd.f32 %v1101_v31, %v652_v22  ;;  %v661_v34 = vpop.f32.mrb[27].mxu0  ;;  %v820_v35 = vpop.f32.mrb[27].mxu1  ;;  %v660_v46 = vadd.f32 %v1561_v47, %v659_v30 }
 0x148   :  { %937 = vst.msk [vmem:[%s1760_s3 + $0x40] sm:$0xff] %vm928_vm0, %v818_v29  ;;  %v821_v37 = vadd.f32 %v820_v35, %v644_v27  ;;  %v729_v34 = vadd.f32 %v1561_v47, %v1546_v24  ;;  %v721_v35 = vadd.f32 %v1561_v47, %v1542_v16  ;;  %v724_v24 = vadd.f32 %v1561_v47, %v1544_v20 }
 0x149   :  { %940 = vst.msk [vmem:[%s1760_s3 + $0x58] sm:$0xff] %vm928_vm0, %v829_v33 }
 0x14a   :  { %938 = vst.msk [vmem:[%s1760_s3 + $0x48] sm:$0xff] %vm928_vm0, %v821_v37 }
 0x14c   :  { %v664_v39 = vpop.f32.mrb[28].mxu0  ;;  %v1104_v41 = vpop.f32.mrb[28].mxu1 }
 0x14d   :  { %v665_v42 = vadd.f32 %v1561_v47, %v664_v39  ;;  %v666_v43 = vpop.f32.mrb[29].mxu0  ;;  %v833_v45 = vpop.f32.mrb[29].mxu1  ;;  %v732_v39 = vadd.f32 %v1561_v47, %v1548_v28 }
 0x14e   :  { %v834_v48 = vadd.f32 %v833_v45, %v657_v38  ;;  %v667_v49 = vpop.f32.mrb[30].mxu0  ;;  %v1105_v50 = vpop.f32.mrb[30].mxu1 }
 0x14f   :  { %v842_v51 = vadd.f32 %v1104_v41, %v665_v42  ;;  %v668_v52 = vadd.f32 %v1561_v47, %v667_v49  ;;  %v669_v53 = vpop.f32.mrb[31].mxu0  ;;  %v836_v54 = vpop.f32.mrb[31].mxu1 }
 0x150   :  { %941 = vst.msk [vmem:[%s1760_s3 + $0x60] sm:$0xff] %vm928_vm0, %v834_v48  ;;  %v837_v55 = vadd.f32 %v836_v54, %v660_v46  ;;  %v745_v54 = vadd.f32 %v1561_v47, %v1554_v40  ;;  %v740_v40 = vadd.f32 %v1561_v47, %v1552_v36 }
 0x151   :  { %943 = vst.msk [vmem:[%s1760_s3 + $0x70] sm:$0xff] %vm928_vm0, %v842_v51  ;;  %v845_v56 = vadd.f32 %v1105_v50, %v668_v52 }
 0x152   :  { %942 = vst.msk [vmem:[%s1760_s3 + $0x68] sm:$0xff] %vm928_vm0, %v837_v55  ;;  %v737_v55 = vadd.f32 %v1561_v47, %v1550_v32 }
 0x153   :  { %944 = vst.msk [vmem:[%s1760_s3 + $0x78] sm:$0xff] %vm928_vm0, %v845_v56 }
 0x154   :  { %v672_v57 = vpop.f32.mrb[32].mxu0  ;;  %v1108_v58 = vpop.f32.mrb[32].mxu1 }
 0x155   :  { %v673_v59 = vadd.f32 %v1561_v47, %v672_v57  ;;  %v674_v60 = vpop.f32.mrb[33].mxu0  ;;  %v849_v61 = vpop.f32.mrb[33].mxu1 }
 0x156   :  { %v675_v62 = vpop.f32.mrb[34].mxu0  ;;  %v1109_v63 = vpop.f32.mrb[34].mxu1 }
 0x157   :  { %v676_v0 = vadd.f32 %v1561_v47, %v675_v62  ;;  %v850_v1 = vadd.f32 %v849_v61, %v673_v59  ;;  %v677_v2 = vpop.f32.mrb[35].mxu0  ;;  %v852_v3 = vpop.f32.mrb[35].mxu1 }
 0x159   :  { %945 = vst.msk [vmem:[%s1760_s3 + $0x80] sm:$0xff] %vm928_vm0, %v850_v1  ;;  %v853_v4 = vadd.f32 %v852_v3, %v676_v0 }
 0x15b   :  { %946 = vst.msk [vmem:[%s1760_s3 + $0x88] sm:$0xff] %vm928_vm0, %v853_v4 }
 0x15c   :  { %v680_v5 = vpop.f32.mrb[36].mxu0  ;;  %v1112_v6 = vpop.f32.mrb[36].mxu1 }
 0x15d   :  { %v681_v7 = vadd.f32 %v1561_v47, %v680_v5  ;;  %v682_v8 = vpop.f32.mrb[37].mxu0  ;;  %v865_v9 = vpop.f32.mrb[37].mxu1 }
 0x15e   :  { %v683_v10 = vpop.f32.mrb[38].mxu0  ;;  %v1113_v11 = vpop.f32.mrb[38].mxu1 }
 0x15f   :  { %v858_v12 = vadd.f32 %v1108_v58, %v681_v7  ;;  %v684_v13 = vadd.f32 %v1561_v47, %v683_v10  ;;  %v685_v14 = vpop.f32.mrb[39].mxu0  ;;  %v868_v15 = vpop.f32.mrb[39].mxu1  ;;  %v748_v58 = vadd.f32 %v1561_v47, %v1556_v44 }
 0x161   :  { %947 = vst.msk [vmem:[%s1760_s3 + $0x90] sm:$0xff] %vm928_vm0, %v858_v12  ;;  %v861_v17 = vadd.f32 %v1109_v63, %v684_v13 }
 0x163   :  { %948 = vst.msk [vmem:[%s1760_s3 + $0x98] sm:$0xff] %vm928_vm0, %v861_v17 }
 0x164   :  { %v688_v18 = vpop.f32.mrb[40].mxu0  ;;  %v1663_v19 = vpop.f32.mrb[40].mxu1 }
 0x165   :  { %v689_v21 = vadd.f32 %v1561_v47, %v688_v18  ;;  %v690_v22 = vpop.f32.mrb[41].mxu0  ;;  %v881_v23 = vpop.f32.mrb[41].mxu1 }
 0x166   :  { %v691_v25 = vpop.f32.mrb[42].mxu0  ;;  %v1666_v26 = vpop.f32.mrb[42].mxu1 }
 0x167   :  { %v866_v27 = vadd.f32 %v865_v9, %v689_v21  ;;  %v692_v29 = vadd.f32 %v1561_v47, %v691_v25  ;;  %v693_v30 = vpop.f32.mrb[43].mxu0  ;;  %v884_v31 = vpop.f32.mrb[43].mxu1 }
 0x169   :  { %949 = vst.msk [vmem:[%s1760_s3 + $0xa0] sm:$0xff] %vm928_vm0, %v866_v27  ;;  %v869_v33 = vadd.f32 %v868_v15, %v692_v29 }
 0x16b   :  { %950 = vst.msk [vmem:[%s1760_s3 + $0xa8] sm:$0xff] %vm928_vm0, %v869_v33 }
 0x16c   :  { %v696_v37 = vpop.f32.mrb[44].mxu0  ;;  %v1120_v38 = vpop.f32.mrb[44].mxu1 }
 0x16d   :  { %v697_v41 = vadd.f32 %v1561_v47, %v696_v37  ;;  %v906_v42 = vadd.f32 %v1120_v38, %v729_v34  ;;  %v698_v43 = vpop.f32.mrb[45].mxu0  ;;  %v897_v45 = vpop.f32.mrb[45].mxu1 }
 0x16e   :  { %v898_v46 = vadd.f32 %v897_v45, %v721_v35  ;;  %v699_v48 = vpop.f32.mrb[46].mxu0  ;;  %v1121_v49 = vpop.f32.mrb[46].mxu1 }
 0x16f   :  { %v874_v50 = vadd.f32 %v1112_v6, %v697_v41  ;;  %959 = vst.msk [vmem:[%s1760_s3 + $0xf0] sm:$0xff] %vm928_vm0, %v906_v42  ;;  %v700_v16 = vadd.f32 %v1561_v47, %v699_v48  ;;  %v909_v28 = vadd.f32 %v1121_v49, %v732_v39  ;;  %v701_v51 = vpop.f32.mrb[47].mxu0  ;;  %v900_v52 = vpop.f32.mrb[47].mxu1 }
 0x170   :  { %957 = vst.msk [vmem:[%s1760_s3 + $0xe0] sm:$0xff] %vm928_vm0, %v898_v46  ;;  %v901_v20 = vadd.f32 %v900_v52, %v724_v24 }
 0x171   :  { %951 = vst.msk [vmem:[%s1760_s3 + $0xb0] sm:$0xff] %vm928_vm0, %v874_v50  ;;  %v877_v53 = vadd.f32 %v1113_v11, %v700_v16  ;;  %960 = vst.msk [vmem:[%s1760_s3 + $0xf8] sm:$0xff] %vm928_vm0, %v909_v28 }
 0x172   :  { %958 = vst.msk [vmem:[%s1760_s3 + $0xe8] sm:$0xff] %vm928_vm0, %v901_v20 }
 0x173   :  { %952 = vst.msk [vmem:[%s1760_s3 + $0xb8] sm:$0xff] %vm928_vm0, %v877_v53 }
 0x174   :  { %v704_v56 = vpop.f32.mrb[48].mxu0  ;;  %v1124_v57 = vpop.f32.mrb[48].mxu1 }
 0x175   :  { %v705_v59 = vadd.f32 %v1561_v47, %v704_v56  ;;  %v922_v60 = vadd.f32 %v1124_v57, %v745_v54  ;;  %v706_v61 = vpop.f32.mrb[49].mxu0  ;;  %v913_v62 = vpop.f32.mrb[49].mxu1 }
 0x176   :  { %v914_v63 = vadd.f32 %v913_v62, %v737_v55  ;;  %v707_v0 = vpop.f32.mrb[50].mxu0  ;;  %v1125_v1 = vpop.f32.mrb[50].mxu1 }
 0x177   :  { %v882_v2 = vadd.f32 %v881_v23, %v705_v59  ;;  %963 = vst.msk [vmem:[%s1760_s3 + $0x110] sm:$0xff] %vm928_vm0, %v922_v60  ;;  %v708_v32 = vadd.f32 %v1561_v47, %v707_v0  ;;  %v925_v44 = vadd.f32 %v1125_v1, %v748_v58  ;;  %v709_v3 = vpop.f32.mrb[51].mxu0  ;;  %v916_v4 = vpop.f32.mrb[51].mxu1 }
 0x178   :  { %961 = vst.msk [vmem:[%s1760_s3 + $0x100] sm:$0xff] %vm928_vm0, %v914_v63  ;;  %v917_v36 = vadd.f32 %v916_v4, %v740_v40 }
 0x179   :  { %953 = vst.msk [vmem:[%s1760_s3 + $0xc0] sm:$0xff] %vm928_vm0, %v882_v2  ;;  %v885_v5 = vadd.f32 %v884_v31, %v708_v32  ;;  %964 = vst.msk [vmem:[%s1760_s3 + $0x118] sm:$0xff] %vm928_vm0, %v925_v44 }
 0x17a   :  { %962 = vst.msk [vmem:[%s1760_s3 + $0x108] sm:$0xff] %vm928_vm0, %v917_v36 }
 0x17b   :  { %954 = vst.msk [vmem:[%s1760_s3 + $0xc8] sm:$0xff] %vm928_vm0, %v885_v5 }
 0x17c   :  { %v712_v6 = vpop.f32.mrb[52].mxu0 }
 0x17d   :  { %v713_v7 = vadd.f32 %v1561_v47, %v712_v6  ;;  %v714_v8 = vpop.f32.mrb[53].mxu0 }
 0x17e   :  { %v715_v9 = vpop.f32.mrb[54].mxu0 }
 0x17f   :  { %v890_v10 = vadd.f32 %v1663_v19, %v713_v7  ;;  %v716_v11 = vadd.f32 %v1561_v47, %v715_v9  ;;  %v717_v12 = vpop.f32.mrb[55].mxu0 }
 0x181   :  { %955 = vst.msk [vmem:[%s1760_s3 + $0xd0] sm:$0xff] %vm928_vm0, %v890_v10  ;;  %v893_v13 = vadd.f32 %v1666_v26, %v716_v11 }
 0x183   :  { %956 = vst.msk [vmem:[%s1760_s3 + $0xd8] sm:$0xff] %vm928_vm0, %v893_v13 }

// kernel: parse_image_forward.5
= control target key start
LH: loop header
LB: loop body
LE: loop exit
PB: predicated region body
PF: predicated region fallthrough
CT: control target
= control target key end

     0   :  { %s264_s12 = smov 0   ;;  %s300_s0 = inlined_call_operand.vmem [shape: f32[2,5,80], index: 0, kind: input, shape index: {}]   ;;  %s301_s1 = inlined_call_operand.vmem [shape: f32[1,80], index: 1, kind: input, shape index: {}]   ;;  %s302_s2 = inlined_call_operand.vmem [shape: f32[1,80], index: 2, kind: input, shape index: {}]   ;;  %s303_s3 = inlined_call_operand.vmem [shape: f32[2,5,80], index: 3, kind: output, shape index: {}]  }
   0x1 LB: > { %s241_s13 = sadd.s32 4294967295, %s266_s12   ;;  %p245_p0 = scmp.ge.s32.totalorder %s266_s12, 1  ;;  %s266_s12 = sphi %s264_s12, %s13_s12  }
   0x2   : > { %p136_p1 = scmp.lt.s32.totalorder %s266_s12, 3 }
   0x4   : > { %p137_p2 = pnand %p245_p0, %p136_p1 }
   0x5   : > { %p158_p3 = scmp.lt.s32.totalorder (!%p137_p2), %s241_s13, 1  ;;  %v248_v0 = vld [vmem:[%s301_s1] ss:$0 sm:$0xff] (!%p137_p2)  ;;  %vm186_vm1 = vcmask (!%p137_p2), 651264  }
   0x6   : > { %140 = sbr.rel (%p137_p2) target bundleno = 25 (0x19), region = 32  ;;  %v249_v2 = vld [vmem:[%s302_s2] ss:$0 sm:$0xff] (!%p137_p2) }
   0xd   : > { %s305_s13 = smov (!%p158_p3, %s241_s13), 1 }
   0xe   : > { %s246_s14 = sshll.u32 %s305_s13, 3 }
   0xf   : > { %s161_s19 = scalar_lea.vmem %s300_s0, %s246_s14  ;;  %s165_s24 = scalar_lea.vmem %s303_s3, %s246_s14 }
  0x10   : > { %v166_v1 = vld [vmem:[%s161_s19] sm:$0x1f] }
  0x11   : > { %v174_v3 = vmul.f32 %v248_v0, %v166_v1 }
  0x13   : > { %v182_v4 = vadd.f32 %v249_v2, %v174_v3 }
  0x15   : > { %vm183_vm0 = vcmp.ge.f32.partialorder %v182_v4, 0.0  ;;  %v184_v5 = vmul.f32 0.1, %v182_v4 }
  0x17   : > { %v185_v6 = vsel %vm183_vm0, %v182_v4, %v184_v5 }
  0x18   : > { %187 = vst.msk [vmem:[%s165_s24] sm:$0x1f] %vm186_vm1, %v185_v6 }
  0x19 PF: > { %s13_s12 = sadd.s32 1, %s266_s12  }
  0x1a   : > { %p10_p4 = scmp.ge.s32.totalorder %s13_s12, 4  }
  0x1c   :  { %12 = sbr.rel (!%p10_p4) target bundleno = 1 (0x1), region = 62 }

</bundles_post_ra>
